<compile_context>
chip_gen: v6e
topology: v6e:2x2x1
jax: 0.10.0
libtpu: 0.0.40
codegen_flags: <defaults>
</compile_context>

<pallas_src>
import functools

import jax
import jax.numpy as jnp
import numpy as np
from jax.experimental import pallas as pl
from jax.experimental.pallas import tpu as pltpu

LANES = 128


def _round_up(x, m):
    return (x + m - 1) // m * m


def _chip_config():
    """Per-generation tuning (block size, core split, VMEM limit)."""
    kind = ""
    try:
        kind = jax.devices()[0].device_kind.lower()
    except Exception:  # pragma: no cover - defensive
        pass
    if "v7" in kind or "7x" in kind:
        # v7x: 2 TensorCores, 64 MiB VMEM, ~1.6 TB/s per-TC HBM -> bigger tiles
        # amortize the ~0.35 us per-grid-step overhead, and split across cores.
        return dict(num_splits=2, max_block_rows=4096, core_parallel=True,
                    vmem_limit_bytes=48 * 1024 * 1024)
    # v5e / v6e: single TensorCore -> no split (avoids a wasted duplicate tile).
    return dict(num_splits=1, max_block_rows=2048, core_parallel=False,
                vmem_limit_bytes=40 * 1024 * 1024)


# ---------------------------------------------------------------------------
# Kernel
# ---------------------------------------------------------------------------
def _masked_loss_kernel(p_ref, t_ref, m_ref, out_ref, acc_ref, *,
                        tiles_per_split, n_tiles, tail_rows,
                        has_duplicates, has_partial):
    i = pl.program_id(1)
    tile = pl.program_id(0) * tiles_per_split + i

    @pl.when(i == 0)
    def _():
        acc_ref[...] = jnp.zeros_like(acc_ref)

    def accumulate(row_limit):
        p = p_ref[...].astype(jnp.float32)
        t = t_ref[...].astype(jnp.float32)
        m = m_ref[...]
        if m.dtype != jnp.bool_:
            m = m != 0
        if row_limit is not None:
            # Only the single genuine partial tile pays this (static limit).
            row_ids = jax.lax.broadcasted_iota(jnp.int32, m.shape, 0)
            m = jnp.logical_and(m, row_ids < row_limit)
        mf = m.astype(jnp.float32)
        # Select-based masking: garbage / NaN from un-DMA'd rows never propagates.
        diff = jnp.where(m, p - t, 0.0)
        # XOR of SIE fields; identical to zero-masking first since 0 < 0.15.
        xor = jnp.logical_and(m, (p >= 0.15) != (t >= 0.15)).astype(jnp.float32)
        acc_ref[0:1, :] += jnp.sum(jnp.abs(diff), axis=0, keepdims=True)   # sum |diff|
        acc_ref[1:2, :] += jnp.sum(diff * diff, axis=0, keepdims=True)     # sum diff^2
        acc_ref[2:3, :] += jnp.sum(mf, axis=0, keepdims=True)              # mask count
        acc_ref[3:4, :] += jnp.sum(xor, axis=0, keepdims=True)             # SIE-XOR count

    if has_partial:
        if n_tiles > 1:
            pl.when(tile < n_tiles - 1)(lambda: accumulate(None))    # hot path
        pl.when(tile == n_tiles - 1)(lambda: accumulate(tail_rows))  # cold path
    elif has_duplicates:
        pl.when(tile < n_tiles)(lambda: accumulate(None))  # duplicates: no compute
    else:
        accumulate(None)                                    # pure fast path

    @pl.when(i == pl.num_programs(1) - 1)
    def _():
        out_ref[...] = acc_ref[...]


# ---------------------------------------------------------------------------
# pallas_call wrapper over (rows, 128) slabs
# ---------------------------------------------------------------------------
def _reduce_partials(p2, t2, m2, rows, *, num_splits, max_block_rows,
                     core_parallel, vmem_limit_bytes):
    """Reduce (rows, 128) slabs -> (4,) sums: [sum|d|, sum d^2, count, xor]."""
    block_rows = min(max_block_rows, _round_up(rows, 32))  # 32: int8/bool granule
    n_tiles = -(-rows // block_rows)
    tiles_per_split = -(-n_tiles // num_splits)
    has_duplicates = (num_splits * tiles_per_split) != n_tiles
    tail_rows = rows - (n_tiles - 1) * block_rows
    has_partial = tail_rows != block_rows
    last_tile = n_tiles - 1

    def row_map(c, i):
        t = c * tiles_per_split + i
        if has_duplicates:
            # Clamp so a duplicate tile's DMA never starts past the array end;
            # its compute is skipped entirely in-kernel.
            t = jnp.minimum(t, last_tile)
        return (t, 0)

    kern = functools.partial(
        _masked_loss_kernel,
        tiles_per_split=tiles_per_split,
        n_tiles=n_tiles,
        tail_rows=tail_rows,
        has_duplicates=has_duplicates,
        has_partial=has_partial,
    )

    split_sem = pltpu.CORE_PARALLEL if core_parallel else pltpu.PARALLEL
    in_spec = pl.BlockSpec((block_rows, LANES), row_map)

    out = pl.pallas_call(
        kern,
        out_shape=jax.ShapeDtypeStruct((num_splits, 4, LANES), jnp.float32),
        grid_spec=pltpu.PrefetchScalarGridSpec(
            num_scalar_prefetch=0,
            grid=(num_splits, tiles_per_split),
            in_specs=[in_spec, in_spec, in_spec],
            out_specs=pl.BlockSpec((None, 4, LANES), lambda c, i: (c, 0, 0)),
            scratch_shapes=[pltpu.VMEM((4, LANES), jnp.float32)],
        ),
        compiler_params=pltpu.CompilerParams(
            dimension_semantics=(split_sem, pltpu.ARBITRARY),
            vmem_limit_bytes=vmem_limit_bytes,
        ),
    )(p2, t2, m2)
    return jnp.sum(out, axis=(0, 2))


# ---------------------------------------------------------------------------
# Feature probes (tiny AOT compiles, cached): bool-mask operands / CORE_PARALLEL
# ---------------------------------------------------------------------------
@functools.lru_cache(maxsize=None)
def _feature_ok(mask_dtype_name, num_splits, core_parallel):
    rows = 64
    fn = functools.partial(
        _reduce_partials, rows=rows, num_splits=num_splits,
        max_block_rows=32,  # smallest block granule the real path ever uses
        core_parallel=core_parallel, vmem_limit_bytes=32 * 1024 * 1024)
    p = jax.ShapeDtypeStruct((rows, LANES), jnp.float32)
    m = jax.ShapeDtypeStruct((rows, LANES), np.dtype(mask_dtype_name))
    try:
        jax.jit(fn).lower(p, p, m).compile()
        return True
    except Exception:
        return False


# ---------------------------------------------------------------------------
# Public wrapper
# ---------------------------------------------------------------------------
@functools.partial(
    jax.jit,
    static_argnames=("use_bool_mask", "num_splits", "max_block_rows",
                     "core_parallel", "vmem_limit_bytes"))
def _masked_loss_impl(preds, target, mask, *, use_bool_mask, num_splits,
                      max_block_rows, core_parallel, vmem_limit_bytes):
    B, T, H, W = preds.shape
    n = B * T * H * W

    def as_stream_float(x):
        # bf16 stays bf16 (halves its HBM bytes); anything else is viewed as f32.
        x = jnp.reshape(x, (-1,))
        if x.dtype.name not in ("float32", "bfloat16"):
            x = x.astype(jnp.float32)
        return x

    p = as_stream_float(preds)
    t = as_stream_float(target)

    m = jnp.reshape(mask, (-1,))
    if m.dtype.name == "bool":
        if not use_bool_mask:
            m = m.astype(jnp.int8)   # fallback when Mosaic lacks bool operands
    elif m.dtype.name not in ("int8", "uint8"):
        m = m.astype(jnp.int8)

    if n % LANES != 0:
        # Rare ragged case: pad < 128 trailing zeros (neutral for all partials).
        pad = _round_up(n, LANES) - n
        p = jnp.pad(p, (0, pad))
        t = jnp.pad(t, (0, pad))
        m = jnp.pad(m, (0, pad))
    rows = p.shape[0] // LANES

    sums = _reduce_partials(
        p.reshape(rows, LANES), t.reshape(rows, LANES), m.reshape(rows, LANES),
        rows=rows, num_splits=num_splits, max_block_rows=max_block_rows,
        core_parallel=core_parallel, vmem_limit_bytes=vmem_limit_bytes)
    sum_abs, sum_sq, count, xor_count = sums[0], sums[1], sums[2], sums[3]

    masked_mae = sum_abs / count
    masked_rmse = jnp.sqrt(sum_sq / count)

    cell_area = 625.0 / 1000000.0
    IIEE = xor_count * cell_area / float(B * T)
    BACC = 1.0 - IIEE / (27207.0 * cell_area)
    loss = masked_mae
    return masked_mae, masked_rmse, IIEE, BACC, loss


def masked_loss(preds, target, mask):
    """preds/target: float (B, T, H, W); mask: bool (B, T, H, W)."""
    cfg = _chip_config()
    core_parallel = cfg["core_parallel"]
    if core_parallel and not _feature_ok("int8", cfg["num_splits"], True):
        # TODO(synk): verify via xprof trace that CORE_PARALLEL engages both v7x
        # TensorCores; fall back to a plain parallel split if it does not lower.
        core_parallel = False
    use_bool_mask = bool(mask.dtype == jnp.bool_) and _feature_ok(
        "bool", cfg["num_splits"], core_parallel)
    return _masked_loss_impl(
        preds, target, mask,
        use_bool_mask=use_bool_mask,
        num_splits=cfg["num_splits"],
        max_block_rows=cfg["max_block_rows"],
        core_parallel=core_parallel,
        vmem_limit_bytes=cfg["vmem_limit_bytes"],
    )


# ---------------------------------------------------------------------------
# Pure-JAX reference (mirrors the PyTorch module)
# ---------------------------------------------------------------------------
def _reference(preds, target, mask):
    m = mask
    mf = m.astype(jnp.float32)
    cnt = jnp.sum(mf)
    diff = jnp.where(m, preds - target, 0.0)
    mae = jnp.sum(jnp.abs(diff)) / cnt
    mse = jnp.sum(diff * diff) / cnt
    rmse = jnp.sqrt(mse)
    zp = jnp.where(m, preds, 0.0)
    zt = jnp.where(m, target, 0.0)
    xor = ((zp >= 0.15) != (zt >= 0.15)).astype(jnp.float32)
    IIEE_bt = jnp.sum(xor, axis=(2, 3)) * 625.0 / 1000000.0
    IIEE = jnp.mean(IIEE_bt)
    BACC = 1.0 - IIEE / (27207.0 * 625.0 / 1000000.0)
    return mae, rmse, IIEE, BACC, mae


if __name__ == "__main__":
    key = jax.random.PRNGKey(0)

    def run_case(shape, case_key):
        kp, kt, km = jax.random.split(case_key, 3)
        preds = jax.random.uniform(kp, shape, dtype=jnp.float32)
        target = jax.random.uniform(kt, shape, dtype=jnp.float32)
        mask = jax.random.bernoulli(km, 0.7, shape)
        out = jax.block_until_ready(masked_loss(preds, target, mask))
        ref = _reference(preds, target, mask)
        for got, want in zip(out, ref):
            np.testing.assert_allclose(np.asarray(got), np.asarray(want),
                                       rtol=1e-5, atol=1e-5)

    k1, k2, k3 = jax.random.split(key, 3)
    run_case((2, 4, 16, 16), k1)      # small: single partial tile (cold branch)
    run_case((2, 4, 256, 256), k2)    # aligned multi-tile fast path
    run_case((2, 3, 37, 53), k3)      # ragged element count (lane-padding path)

    print("KERNEL_OK")
</pallas_src>

<mosaic_0001>
module attributes {stable_mosaic.version = 11 : i64} {
  func.func @_masked_loss_kernel(%arg0: i32, %arg1: i32, %arg2: memref<32x128xf32, #tpu.memory_space<vmem>>, %arg3: memref<32x128xf32, #tpu.memory_space<vmem>>, %arg4: memref<32x128xi8, #tpu.memory_space<vmem>>, %arg5: memref<1x4x128xf32, #tpu.memory_space<vmem>>, %arg6: memref<4x128xf32, #tpu.memory_space<vmem>>) attributes {dimension_semantics = [#tpu.dimension_semantics<parallel>, #tpu.dimension_semantics<arbitrary>], iteration_bounds = array<i64: 1, 1>, scalar_prefetch = 0 : i64, scratch_operands = 1 : i64, tpu.core_type = #tpu.core_type<tc>, window_params = [{transform_indices = @transform_0, window_bounds = array<i64: 32, 128>}, {transform_indices = @transform_1, window_bounds = array<i64: 32, 128>}, {transform_indices = @transform_2, window_bounds = array<i64: 32, 128>}, {transform_indices = @transform_3, window_bounds = array<i64: 1, 4, 128>}]} {
    %c1_i32 = arith.constant 1 : i32
    %0 = arith.muli %arg0, %c1_i32 : i32
    %1 = arith.addi %0, %arg1 : i32
    %c0_i32 = arith.constant 0 : i32
    %2 = arith.cmpi eq, %arg1, %c0_i32 : i32
    %3 = arith.extui %2 : i1 to i32
    %c0_i32_0 = arith.constant 0 : i32
    %4 = arith.cmpi ne, %3, %c0_i32_0 : i32
    scf.if %4 {
      %cst = arith.constant 0.000000e+00 : f32
      %11 = vector.broadcast %cst : f32 to vector<4x128xf32>
      %c0 = arith.constant 0 : index
      %c0_5 = arith.constant 0 : index
      %12 = vector.load %arg6[%c0, %c0_5] : memref<4x128xf32, #tpu.memory_space<vmem>>, vector<4x128xf32>
      tpu.vector_store %arg6[%c0, %c0_5], %11 {strides = array<i32>} : memref<4x128xf32, #tpu.memory_space<vmem>>, vector<4x128xf32>,
    } else {
    }
    %c0_i32_1 = arith.constant 0 : i32
    %5 = arith.cmpi eq, %1, %c0_i32_1 : i32
    %6 = arith.extui %5 : i1 to i32
    %c0_i32_2 = arith.constant 0 : i32
    %7 = arith.cmpi ne, %6, %c0_i32_2 : i32
    scf.if %7 {
      %c0 = arith.constant 0 : index
      %c0_5 = arith.constant 0 : index
      %11 = vector.load %arg2[%c0, %c0_5] : memref<32x128xf32, #tpu.memory_space<vmem>>, vector<32x128xf32>
      %c0_6 = arith.constant 0 : index
      %c0_7 = arith.constant 0 : index
      %12 = vector.load %arg3[%c0_6, %c0_7] : memref<32x128xf32, #tpu.memory_space<vmem>>, vector<32x128xf32>
      %c0_8 = arith.constant 0 : index
      %c0_9 = arith.constant 0 : index
      %13 = vector.load %arg4[%c0_8, %c0_9] : memref<32x128xi8, #tpu.memory_space<vmem>>, vector<32x128xi8>
      %c0_i8 = arith.constant 0 : i8
      %14 = vector.broadcast %c0_i8 : i8 to vector<32x128xi8>
      %15 = arith.cmpi ne, %13, %14 : vector<32x128xi8>
      %16 = tpu.iota {dimensions = array<i32: 0>} : vector<32x128xi32>
      %c16_i32 = arith.constant 16 : i32
      %17 = vector.broadcast %c16_i32 : i32 to vector<32x128xi32>
      %18 = arith.cmpi slt, %16, %17 : vector<32x128xi32>
      %19 = arith.andi %15, %18 : vector<32x128xi1>
      %20 = arith.extui %19 : vector<32x128xi1> to vector<32x128xi32>
      %21 = arith.sitofp %20 : vector<32x128xi32> to vector<32x128xf32>
      %22 = arith.subf %11, %12 : vector<32x128xf32>
      %cst = arith.constant 0.000000e+00 : f32
      %23 = vector.broadcast %cst : f32 to vector<32x128xf32>
      %24 = arith.select %19, %22, %23 : vector<32x128xi1>, vector<32x128xf32>
      %cst_10 = arith.constant 1.500000e-01 : f32
      %25 = vector.broadcast %cst_10 : f32 to vector<32x128xf32>
      %26 = arith.cmpf oge, %11, %25 : vector<32x128xf32>
      %cst_11 = arith.constant 1.500000e-01 : f32
      %27 = vector.broadcast %cst_11 : f32 to vector<32x128xf32>
      %28 = arith.cmpf oge, %12, %27 : vector<32x128xf32>
      %29 = arith.xori %26, %28 : vector<32x128xi1>
      %30 = arith.andi %19, %29 : vector<32x128xi1>
      %31 = arith.extui %30 : vector<32x128xi1> to vector<32x128xi32>
      %32 = arith.sitofp %31 : vector<32x128xi32> to vector<32x128xf32>
      %c0_12 = arith.constant 0 : index
      %c0_13 = arith.constant 0 : index
      %33 = vector.load %arg6[%c0_12, %c0_13] : memref<4x128xf32, #tpu.memory_space<vmem>>, vector<1x128xf32>
      %34 = math.absf %24 : vector<32x128xf32>
      %cst_14 = arith.constant dense<0.000000e+00> : vector<128xf32>
      %35 = vector.multi_reduction <add>, %34, %cst_14 [0] : vector<32x128xf32> to vector<128xf32>
      %36 = vector.shape_cast %35 : vector<128xf32> to vector<1x128xf32>
      %37 = arith.addf %33, %36 : vector<1x128xf32>
      %c0_15 = arith.constant 0 : index
      %c0_16 = arith.constant 0 : index
      %38 = vector.load %arg6[%c0_15, %c0_16] : memref<4x128xf32, #tpu.memory_space<vmem>>, vector<1x128xf32>
      tpu.vector_store %arg6[%c0_15, %c0_16], %37 {strides = array<i32>} : memref<4x128xf32, #tpu.memory_space<vmem>>, vector<1x128xf32>,
      %c1 = arith.constant 1 : index
      %c0_17 = arith.constant 0 : index
      %39 = vector.load %arg6[%c1, %c0_17] : memref<4x128xf32, #tpu.memory_space<vmem>>, vector<1x128xf32>
      %40 = arith.mulf %24, %24 : vector<32x128xf32>
      %cst_18 = arith.constant dense<0.000000e+00> : vector<128xf32>
      %41 = vector.multi_reduction <add>, %40, %cst_18 [0] : vector<32x128xf32> to vector<128xf32>
      %42 = vector.shape_cast %41 : vector<128xf32> to vector<1x128xf32>
      %43 = arith.addf %39, %42 : vector<1x128xf32>
      %c1_19 = arith.constant 1 : index
      %c0_20 = arith.constant 0 : index
      %44 = vector.load %arg6[%c1_19, %c0_20] : memref<4x128xf32, #tpu.memory_space<vmem>>, vector<1x128xf32>
      tpu.vector_store %arg6[%c1_19, %c0_20], %43 {strides = array<i32>} : memref<4x128xf32, #tpu.memory_space<vmem>>, vector<1x128xf32>,
      %c2 = arith.constant 2 : index
      %c0_21 = arith.constant 0 : index
      %45 = vector.load %arg6[%c2, %c0_21] : memref<4x128xf32, #tpu.memory_space<vmem>>, vector<1x128xf32>
      %cst_22 = arith.constant dense<0.000000e+00> : vector<128xf32>
      %46 = vector.multi_reduction <add>, %21, %cst_22 [0] : vector<32x128xf32> to vector<128xf32>
      %47 = vector.shape_cast %46 : vector<128xf32> to vector<1x128xf32>
      %48 = arith.addf %45, %47 : vector<1x128xf32>
      %c2_23 = arith.constant 2 : index
      %c0_24 = arith.constant 0 : index
      %49 = vector.load %arg6[%c2_23, %c0_24] : memref<4x128xf32, #tpu.memory_space<vmem>>, vector<1x128xf32>
      tpu.vector_store %arg6[%c2_23, %c0_24], %48 {strides = array<i32>} : memref<4x128xf32, #tpu.memory_space<vmem>>, vector<1x128xf32>,
      %c3 = arith.constant 3 : index
      %c0_25 = arith.constant 0 : index
      %50 = vector.load %arg6[%c3, %c0_25] : memref<4x128xf32, #tpu.memory_space<vmem>>, vector<1x128xf32>
      %cst_26 = arith.constant dense<0.000000e+00> : vector<128xf32>
      %51 = vector.multi_reduction <add>, %32, %cst_26 [0] : vector<32x128xf32> to vector<128xf32>
      %52 = vector.shape_cast %51 : vector<128xf32> to vector<1x128xf32>
      %53 = arith.addf %50, %52 : vector<1x128xf32>
      %c3_27 = arith.constant 3 : index
      %c0_28 = arith.constant 0 : index
      %54 = vector.load %arg6[%c3_27, %c0_28] : memref<4x128xf32, #tpu.memory_space<vmem>>, vector<1x128xf32>
      tpu.vector_store %arg6[%c3_27, %c0_28], %53 {strides = array<i32>} : memref<4x128xf32, #tpu.memory_space<vmem>>, vector<1x128xf32>,
    } else {
    }
    %c0_i32_3 = arith.constant 0 : i32
    %8 = arith.cmpi eq, %arg1, %c0_i32_3 : i32
    %9 = arith.extui %8 : i1 to i32
    %c0_i32_4 = arith.constant 0 : i32
    %10 = arith.cmpi ne, %9, %c0_i32_4 : i32
    scf.if %10 {
      %c0 = arith.constant 0 : index
      %c0_5 = arith.constant 0 : index
      %11 = vector.load %arg6[%c0, %c0_5] : memref<4x128xf32, #tpu.memory_space<vmem>>, vector<4x128xf32>
      %c0_6 = arith.constant 0 : index
      %c0_7 = arith.constant 0 : index
      %c0_8 = arith.constant 0 : index
      %12 = vector.load %arg5[%c0_6, %c0_7, %c0_8] : memref<1x4x128xf32, #tpu.memory_space<vmem>>, vector<1x4x128xf32>
      %13 = vector.shape_cast %12 : vector<1x4x128xf32> to vector<4x128xf32>
      %14 = vector.shape_cast %11 : vector<4x128xf32> to vector<1x4x128xf32>
      tpu.vector_store %arg5[%c0_6, %c0_7, %c0_8], %14 {strides = array<i32>} : memref<1x4x128xf32, #tpu.memory_space<vmem>>, vector<1x4x128xf32>,
    } else {
    }
    return
  }
  func.func @transform_0(%arg0: i32, %arg1: i32) -> (i32, i32) {
    %c1_i32 = arith.constant 1 : i32
    %0 = arith.muli %arg0, %c1_i32 : i32
    %1 = arith.addi %0, %arg1 : i32
    %c0_i32 = arith.constant 0 : i32
    %c0_i32_0 = arith.constant 0 : i32
    return %1, %c0_i32 : i32, i32
  }
  func.func @transform_1(%arg0: i32, %arg1: i32) -> (i32, i32) {
    %c1_i32 = arith.constant 1 : i32
    %0 = arith.muli %arg0, %c1_i32 : i32
    %1 = arith.addi %0, %arg1 : i32
    %c0_i32 = arith.constant 0 : i32
    %c0_i32_0 = arith.constant 0 : i32
    return %1, %c0_i32 : i32, i32
  }
  func.func @transform_2(%arg0: i32, %arg1: i32) -> (i32, i32) {
    %c1_i32 = arith.constant 1 : i32
    %0 = arith.muli %arg0, %c1_i32 : i32
    %1 = arith.addi %0, %arg1 : i32
    %c0_i32 = arith.constant 0 : i32
    %c0_i32_0 = arith.constant 0 : i32
    return %1, %c0_i32 : i32, i32
  }
  func.func @transform_3(%arg0: i32, %arg1: i32) -> (i32, i32, i32) {
    %c0_i32 = arith.constant 0 : i32
    %c0_i32_0 = arith.constant 0 : i32
    %c0_i32_1 = arith.constant 0 : i32
    return %arg0, %c0_i32, %c0_i32_0 : i32, i32, i32
  }
}

</mosaic_0001>

<bundles_post_ra>
// kernel: _masked_loss_impl.1
= control target key start
LH: loop header
LB: loop body
LE: loop exit
PB: predicated region body
PF: predicated region fallthrough
CT: control target
= control target key end

     0   :  { %v326_v0 = vmov 0.0   ;;  %vm327_vm0 = vmmov 1   ;;  %vm328_vm5 = vmmov 0   ;;  %v329_v19 = vmov 0   ;;  %s560_s2 = inlined_call_operand.vmem [shape: s8[16,128], index: 2, kind: input, shape index: {}]   ;;  %s561_s0 = inlined_call_operand.vmem [shape: f32[16,128], index: 0, kind: input, shape index: {}]   ;;  %s562_s1 = inlined_call_operand.vmem [shape: f32[16,128], index: 1, kind: input, shape index: {}]   ;;  %s563_s3 = inlined_call_operand.vmem [shape: f32[1,4,128], index: 3, kind: output, shape index: {}]  }
   0x1   :  { %117 = vst [vmem:[#allocation2] sm:$0xf] %v326_v0  ;;  %v130_v1 = vld [vmem:[%s560_s2] sm:$0x3]  ;;  %v131_v2 = vld [vmem:[%s560_s2 + $0x2] sm:$0x3]  ;;  %vm363_vm1 = vmpackc.low %vm327_vm0, %vm327_vm0 }
   0x2   :  { %v122_v3 = vld [vmem:[%s561_s0] sm:$0xff]  ;;  %v123_v6 = vld [vmem:[%s561_s0 + $0x8] sm:$0xff]  ;;  %vm134_vm2 = vnez %v130_v1  ;;  %vm148_vm3 = vmpackc.even %vm363_vm1, %vm363_vm1  ;;  %vm135_vm4 = vnez %v131_v2 }
   0x3   :  { %v132_v4 = vld [vmem:[%s560_s2 + $0x4] sm:$0x3]  ;;  %v133_v7 = vld [vmem:[%s560_s2 + $0x6] sm:$0x3]  ;;  %v124_v8 = vld [vmem:[%s561_s0 + $0x10] sm:$0xff] }
   0x4   :  { %v126_v9 = vld [vmem:[%s562_s1] sm:$0xff]  ;;  %vm382_vm6 = vmpackc.low %vm328_vm5, %vm328_vm5  ;;  %v125_v11 = vld [vmem:[%s561_s0 + $0x18] sm:$0xff]  ;;  %vm136_vm7 = vnez %v132_v4  ;;  %vm187_vm9 = vcmp.ge.f32.partialorder %v122_v3, 0.15  ;;  %vm137_vm10 = vnez %v133_v7  ;;  %vm188_vm12 = vcmp.ge.f32.partialorder %v123_v6, 0.15 }
   0x5   :  { %v127_v12 = vld [vmem:[%s562_s1 + $0x8] sm:$0xff]  ;;  %vm152_vm8 = vmpackc.even %vm382_vm6, %vm382_vm6  ;;  %v128_v13 = vld [vmem:[%s562_s1 + $0x10] sm:$0xff]  ;;  %v179_v16 = vsub.f32 %v122_v3, %v126_v9  ;;  %vm191_vm14 = vcmp.ge.f32.partialorder %v126_v9, 0.15  ;;  %vm189_vm0 = vcmp.ge.f32.partialorder %v124_v8, 0.15 }
   0x6   :  { %v129_v14 = vld [vmem:[%s562_s1 + $0x18] sm:$0xff]  ;;  %vm407_vm11 = vmand %vm134_vm2, %vm148_vm3  ;;  %v180_v17 = vsub.f32 %v123_v6, %v127_v12  ;;  %v181_v21 = vsub.f32 %v124_v8, %v128_v13  ;;  %vm192_vm1 = vcmp.ge.f32.partialorder %v127_v12, 0.15 }
   0x7   :  { %vm417_vm13 = vmand %vm135_vm4, %vm148_vm3  ;;  %v159_v20 = vsel %vm407_vm11, 16843009, %v329_v19  ;;  %v182_v22 = vsub.f32 %v125_v11, %v129_v14  ;;  %vm193_vm4 = vcmp.ge.f32.partialorder %v128_v13, 0.15 }
   0x8   :  { %vm430_vm15 = vmand %vm136_vm7, %vm152_vm8  ;;  %v160_v24 = vsel %vm417_vm13, 16843009, %v329_v19  ;;  %v163_v25 = vunpack.c.0.s8 %v159_v20  ;;  %vm194_vm7 = vcmp.ge.f32.partialorder %v129_v14, 0.15  ;;  %v231_v31 = vld [vmem:[#allocation2] sm:$0x1] }
   0x9   :  { %vm443_vm2 = vmand %vm137_vm10, %vm152_vm8  ;;  %v161_v27 = vsel %vm430_vm15, 16843009, %v329_v19  ;;  %v164_v28 = vunpack.c.0.s8 %v160_v24  ;;  %v263_v36 = vld [vmem:[#allocation2 + $0x2] sm:$0x1] }
   0xa   :  { %v162_v29 = vsel %vm443_vm2, 16843009, %v329_v19  ;;  %v165_v30 = vunpack.c.0.s8 %v161_v27  ;;  %vm167_vm5 = vcmp.ne.s32.totalorder %v163_v25, 0  ;;  %vm455_vm6 = vmxor %vm187_vm9, %vm191_vm14 }
   0xb   :  { %v166_v32 = vunpack.c.0.s8 %v162_v29  ;;  %vm459_vm8 = vcmp.ne.s32.totalorder %v164_v28, 0  ;;  %v183_v34 = vsel %vm167_vm5, %v179_v16, 0.0  ;;  %v314_v35 = vsel %vm167_vm5, 1.0, %v326_v0  ;;  %vm466_vm10 = vmxor %vm188_vm12, %vm192_vm1 }
   0xc   :  { %vm470_vm3 = vcmp.ne.s32.totalorder %v165_v30, 0  ;;  %v184_v38 = vsel %vm459_vm8, %v180_v17, 0.0  ;;  %v232_v39 = vand.u32 2147483647, %v183_v34  ;;  %v248_v40 = vmul.f32 %v183_v34, %v183_v34  ;;  %vm478_vm9 = vmxor %vm189_vm0, %vm193_vm4 }
   0xd   :  { %vm482_vm14 = vcmp.ne.s32.totalorder %v166_v32, 0  ;;  %v185_v43 = vsel %vm470_vm3, %v181_v21, 0.0  ;;  %v233_v44 = vand.u32 2147483647, %v184_v38  ;;  %v249_v45 = vmul.f32 %v184_v38, %v184_v38  ;;  %vm199_vm0 = vmpackc.low %vm455_vm6, %vm455_vm6  ;;  %v247_v32 = vld [vmem:[#allocation2 + $0x1] sm:$0x1] }
   0xe   :  { %vm588_vm12 = vcmp.ge.f32.partialorder %v125_v11, 0.15  ;;  %v186_v47 = vsel %vm482_vm14, %v182_v22, 0.0  ;;  %v234_v48 = vand.u32 2147483647, %v185_v43  ;;  %v250_v49 = vmul.f32 %v185_v43, %v185_v43  ;;  %vm502_vm4 = vmpackc.even %vm199_vm0, %vm199_vm0 }
   0xf   :  { %vm490_vm1 = vmxor %vm588_vm12, %vm194_vm7  ;;  %v315_v50 = vsel %vm459_vm8, 1.0, %v326_v0  ;;  %v235_v51 = vand.u32 2147483647, %v186_v47  ;;  %v236_v52 = vadd.f32 %v233_v44, %v232_v39  ;;  %v251_v53 = vmul.f32 %v186_v47, %v186_v47 }
  0x10   :  { %v252_v54 = vadd.f32 %v249_v45, %v248_v40  ;;  %v316_v56 = vsel %vm470_vm3, 1.0, %v326_v0  ;;  %v264_v57 = vadd.f32 %v315_v50, %v314_v35  ;;  %vm201_vm5 = vmpackc.low %vm466_vm10, %vm466_vm10  ;;  %v317_v60 = vsel %vm482_vm14, 1.0, %v326_v0 }
  0x11   :  { %v237_v58 = vadd.f32 %v236_v52, %v234_v48  ;;  %vm515_vm7 = vmpackc.even %vm201_vm5, %vm201_vm5 }
  0x12   :  { %v253_v59 = vadd.f32 %v252_v54, %v250_v49  ;;  %v265_v62 = vadd.f32 %v316_v56, %v264_v57  ;;  %vm203_vm3 = vmpackc.low %vm478_vm9, %vm478_vm9  ;;  %v275_v49 = vld [vmem:[#allocation2 + $0x3] sm:$0x1] }
  0x13   :  { %v238_v63 = vadd.f32 %v237_v58, %v235_v51  ;;  %vm522_vm6 = vmpackc.even %vm203_vm3, %vm203_vm3 }
  0x14   :  { %v254_v1 = vadd.f32 %v253_v59, %v251_v53  ;;  %v266_v3 = vadd.f32 %v317_v60, %v265_v62  ;;  %vm205_vm8 = vmpackc.low %vm490_vm1, %vm490_vm1 }
  0x15   :  { %v239_v4 = vrot.slane %v238_v63, 4  ;;  %vm529_vm10 = vmpackc.even %vm205_vm8, %vm205_vm8 }
  0x16   :  { %v255_v5 = vrot.slane %v254_v1, 4  ;;  %v267_v7 = vrot.slane %v266_v3, 4  ;;  %vm207_vm9 = vmand %vm407_vm11, %vm502_vm4 }
  0x17   :  { %v240_v8 = vadd.f32 %v239_v4, %v238_v63  ;;  %vm208_vm14 = vmand %vm417_vm13, %vm515_vm7  ;;  %v211_v10 = vsel %vm207_vm9, 16843009, %v329_v19 }
  0x18   :  { %v256_v9 = vadd.f32 %v255_v5, %v254_v1  ;;  %v268_v11 = vadd.f32 %v267_v7, %v266_v3  ;;  %vm209_vm12 = vmand %vm430_vm15, %vm522_vm6  ;;  %v212_v12 = vsel %vm208_vm14, 16843009, %v329_v19  ;;  %v215_v13 = vunpack.c.0.s8 %v211_v10 }
  0x19   :  { %v241_v14 = vrot.slane %v240_v8, 2  ;;  %vm210_vm11 = vmand %vm443_vm2, %vm529_vm10  ;;  %v213_v16 = vsel %vm209_vm12, 16843009, %v329_v19  ;;  %v216_v17 = vunpack.c.0.s8 %v212_v12 }
  0x1a   :  { %v257_v15 = vrot.slane %v256_v9, 2  ;;  %v269_v18 = vrot.slane %v268_v11, 2  ;;  %v214_v20 = vsel %vm210_vm11, 16843009, %v329_v19  ;;  %v217_v21 = vunpack.c.0.s8 %v213_v16 }
  0x1b   :  { %vm219_vm13 = vcmp.ne.s32.totalorder %v215_v13, 0  ;;  %v242_v22 = vadd.f32 %v241_v14, %v240_v8  ;;  %v218_v24 = vunpack.c.0.s8 %v214_v20  ;;  %vm220_vm15 = vcmp.ne.s32.totalorder %v216_v17, 0 }
  0x1c   :  { %v258_v23 = vadd.f32 %v257_v15, %v256_v9  ;;  %v270_v25 = vadd.f32 %v269_v18, %v268_v11  ;;  %vm221_vm1 = vcmp.ne.s32.totalorder %v217_v21, 0  ;;  %v318_v27 = vsel %vm219_vm13, 1.0, %v326_v0 }
  0x1d   :  { %v319_v28 = vsel %vm220_vm15, 1.0, %v326_v0  ;;  %v243_v26 = vrot.slane %v242_v22, 1  ;;  %vm222_vm2 = vcmp.ne.s32.totalorder %v218_v24, 0  ;;  %v320_v30 = vsel %vm221_vm1, 1.0, %v326_v0 }
  0x1e   :  { %v259_v29 = vrot.slane %v258_v23, 1  ;;  %v271_v19 = vrot.slane %v270_v25, 1  ;;  %v276_v33 = vadd.f32 %v319_v28, %v318_v27  ;;  %v321_v37 = vsel %vm222_vm2, 1.0, %v326_v0 }
  0x1f   :  { %v244_v34 = vadd.f32 %v243_v26, %v242_v22 }
  0x20   :  { %v260_v35 = vadd.f32 %v259_v29, %v258_v23  ;;  %v272_v38 = vadd.f32 %v271_v19, %v270_v25  ;;  %v277_v39 = vadd.f32 %v320_v30, %v276_v33 }
  0x21   :  { %v245_v40 = vadd.f32 %v244_v34, %v231_v31 }
  0x22   :  { %v261_v41 = vadd.f32 %v260_v35, %v247_v32  ;;  %v273_v42 = vadd.f32 %v272_v38, %v263_v36  ;;  %v278_v43 = vadd.f32 %v321_v37, %v277_v39 }
  0x23   :  { %246 = vst [vmem:[#allocation2] sm:$0x1] %v245_v40 }
  0x24   :  { %262 = vst [vmem:[#allocation2 + $0x1] sm:$0x1] %v261_v41  ;;  %274 = vst [vmem:[#allocation2 + $0x2] sm:$0x1] %v273_v42  ;;  %v279_v44 = vrot.slane %v278_v43, 4 }
  0x26   :  { %v280_v45 = vadd.f32 %v279_v44, %v278_v43 }
  0x28   :  { %v281_v46 = vrot.slane %v280_v45, 2 }
  0x2a   :  { %v282_v47 = vadd.f32 %v281_v46, %v280_v45 }
  0x2c   :  { %v283_v48 = vrot.slane %v282_v47, 1 }
  0x2e   :  { %v284_v50 = vadd.f32 %v283_v48, %v282_v47 }
  0x30   :  { %v285_v51 = vadd.f32 %v284_v50, %v275_v49 }
  0x32   :  { %286 = vst [vmem:[#allocation2 + $0x3] sm:$0x1] %v285_v51 }
  0x39   :  { %v290_v52 = vld [vmem:[#allocation2] sm:$0xf] }
  0x3a   :  { %291 = vst [vmem:[%s563_s3] sm:$0xf] %v290_v52 }

</bundles_post_ra>
